<compile_context>
chip_gen: v7x
topology: tpu7x:2x2x1
jax: 0.10.0
libtpu: 0.0.40
codegen_flags: <defaults>
</compile_context>

<pallas_src>
import jax
import jax.numpy as jnp
from jax import lax
from jax.experimental import pallas as pl
from jax.experimental.pallas import tpu as pltpu

_NEW_POINTS = 400       # np.linspace(rand_start, rand_start + 199, 400)
_SPAN = 199.0
_RAND_START_MAX = 200   # random.randint(0, 200) is inclusive on both ends


def _interp_kernel(x_ref, m_ref, o_ref):
    """One row tile: (tm, W) @ (W, W) -> (tm, W) on the MXU."""
    o_ref[...] = jnp.dot(
        x_ref[...], m_ref[...], preferred_element_type=jnp.float32
    ).astype(o_ref.dtype)


def _interp_matrix(rand_start, w, dtype):
    """(w, w) two-banded linear-interpolation matrix, built once in plain JAX
    (row-invariant weights hoisted out of the kernel's per-element path)."""
    rs = rand_start.astype(jnp.float32)
    x_new = jnp.linspace(rs, rs + jnp.float32(_SPAN), _NEW_POINTS)       # (400,)
    i0 = jnp.clip(jnp.floor(x_new).astype(jnp.int32), 0, w - 2)          # (400,)
    t = x_new - i0.astype(jnp.float32)                                   # (400,)
    src = jnp.arange(w, dtype=jnp.int32)[:, None]                        # (w, 1)
    lo = jnp.where(src == i0[None, :], 1.0 - t[None, :], 0.0)
    hi = jnp.where(src == i0[None, :] + 1, t[None, :], 0.0)
    return (lo + hi).astype(dtype)                                       # (w, 400)


def _resample_rows(dat, interp_mat, block_rows=512):
    h, w = dat.shape
    # Row-tile size: full H if small, otherwise a multiple-of-8 block
    # (0.8 MiB/buffer at 512x400 f32 -> well under v5e/v7x scoped VMEM).
    tm = h if h <= block_rows else max(8, (block_rows // 8) * 8)
    return pl.pallas_call(
        _interp_kernel,
        out_shape=jax.ShapeDtypeStruct((h, w), dat.dtype),
        grid_spec=pltpu.PrefetchScalarGridSpec(
            num_scalar_prefetch=0,
            grid=(pl.cdiv(h, tm),),
            in_specs=[
                pl.BlockSpec((tm, w), lambda i: (i, 0)),   # row tile
                pl.BlockSpec((w, w), lambda i: (0, 0)),    # interp matrix (resident)
            ],
            out_specs=pl.BlockSpec((tm, w), lambda i: (i, 0)),
        ),
        input_output_aliases={0: 0},                        # donate csi rows
        compiler_params=pltpu.CompilerParams(
            dimension_semantics=("parallel",),              # shard rows on v7x's 2 TCs
        ),
    )(dat, interp_mat)


class RandInterpolation:
    """JAX/Pallas port of the PyTorch RandInterpolation module (jit-friendly)."""

    def __init__(self, p, block_rows=512):
        self.p = float(p)
        self.block_rows = int(block_rows)

    def __call__(self, csi, key):
        dat = jnp.squeeze(csi)
        assert dat.ndim == 2, "RandInterpolation expects a squeezable 2D CSI matrix"
        h, w = dat.shape
        assert w == _NEW_POINTS, (
            f"RandInterpolation requires W == {_NEW_POINTS} (got {w}); the PyTorch "
            "module writes 400 resampled points back into each row."
        )

        k_gate, k_start = jax.random.split(key)
        u = jax.random.uniform(k_gate)                                    # traced gate
        rand_start = jax.random.randint(k_start, (), 0, _RAND_START_MAX + 1)

        def _apply(args):
            d, rs = args
            m = _interp_matrix(rs, w, d.dtype)
            return _resample_rows(d, m, self.block_rows)

        def _skip(args):
            return args[0]

        # TODO(synk): the PyTorch module mutates its input in place (dat aliases
        # csi); JAX is functional, so only the returned value carries the result.
        out2d = lax.cond(u <= self.p, _apply, _skip, (dat, rand_start))
        return jnp.reshape(out2d, (1, h, w))

    def __repr__(self) -> str:
        return f"{self.__class__.__name__}()"


if __name__ == "__main__":
    key = jax.random.PRNGKey(0)
    k_in, k_mod = jax.random.split(key)

    H, W = 64, 400                       # W = 400 is mandated by the module spec
    csi = jax.random.normal(k_in, (1, H, W), dtype=jnp.float32)

    # p = 1.0 -> interpolation path always taken (deterministic demo);
    # block_rows = 16 exercises a 4-step parallel row grid.
    module = RandInterpolation(p=1.0, block_rows=16)
    fwd = jax.jit(module.__call__)
    out = jax.block_until_ready(fwd(csi, k_mod))
    assert out.shape == (1, H, W)

    # Independent reference (plain JAX jnp.interp per row) using the same draws.
    k_gate, k_start = jax.random.split(k_mod)
    rs = jax.random.randint(k_start, (), 0, _RAND_START_MAX + 1).astype(jnp.float32)
    x_old = jnp.arange(W, dtype=jnp.float32)
    x_new = jnp.linspace(rs, rs + jnp.float32(_SPAN), _NEW_POINTS)
    dat = jnp.squeeze(csi)
    ref = jax.vmap(lambda row: jnp.interp(x_new, x_old, row))(dat).reshape(1, H, W)

    # Tolerance allows for the MXU's f32 pass decomposition; any indexing /
    # weighting bug would show up as O(1) errors.
    err = float(jnp.max(jnp.abs(out - ref)))
    assert jnp.allclose(out, ref, atol=2e-2, rtol=2e-2), err
    print("KERNEL_OK")
</pallas_src>

<mosaic_0001>
module attributes {stable_mosaic.version = 11 : i64} {
  func.func @_interp_kernel(%arg0: i32, %arg1: memref<16x400xf32, #tpu.memory_space<vmem>>, %arg2: memref<400x400xf32, #tpu.memory_space<vmem>>, %arg3: memref<16x400xf32, #tpu.memory_space<vmem>>) attributes {dimension_semantics = [#tpu.dimension_semantics<parallel>], iteration_bounds = array<i64: 4>, scalar_prefetch = 0 : i64, scratch_operands = 0 : i64, tpu.core_type = #tpu.core_type<tc>, window_params = [{transform_indices = @transform_0, window_bounds = array<i64: 16, 400>}, {pipeline_mode = #tpu.pipeline_mode<synchronous>, transform_indices = @transform_1, window_bounds = array<i64: 400, 400>}, {transform_indices = @transform_2, window_bounds = array<i64: 16, 400>}]} {
    %c0 = arith.constant 0 : index
    %c0_0 = arith.constant 0 : index
    %0 = vector.load %arg1[%c0, %c0_0] : memref<16x400xf32, #tpu.memory_space<vmem>>, vector<16x400xf32>
    %c0_1 = arith.constant 0 : index
    %c0_2 = arith.constant 0 : index
    %1 = vector.load %arg2[%c0_1, %c0_2] : memref<400x400xf32, #tpu.memory_space<vmem>>, vector<400x400xf32>
    %cst = arith.constant dense<0.000000e+00> : vector<16x400xf32>
    %2 = tpu.matmul %0, %1, %cst {dimension_numbers = #tpu.dot_dimension_numbers<[1], [0], [0], [1], [0, 0, 1, 1], [], []>} : vector<16x400xf32>, vector<400x400xf32>, vector<16x400xf32> -> vector<16x400xf32>
    %c0_3 = arith.constant 0 : index
    %c0_4 = arith.constant 0 : index
    %3 = vector.load %arg3[%c0_3, %c0_4] : memref<16x400xf32, #tpu.memory_space<vmem>>, vector<16x400xf32>
    tpu.vector_store %arg3[%c0_3, %c0_4], %2 {strides = array<i32>} : memref<16x400xf32, #tpu.memory_space<vmem>>, vector<16x400xf32>,
    return
  }
  func.func @transform_0(%arg0: i32) -> (i32, i32) {
    %c0_i32 = arith.constant 0 : i32
    %c0_i32_0 = arith.constant 0 : i32
    return %arg0, %c0_i32 : i32, i32
  }
  func.func @transform_1(%arg0: i32) -> (i32, i32) {
    %c0_i32 = arith.constant 0 : i32
    %c0_i32_0 = arith.constant 0 : i32
    %c0_i32_1 = arith.constant 0 : i32
    return %c0_i32, %c0_i32_0 : i32, i32
  }
  func.func @transform_2(%arg0: i32) -> (i32, i32) {
    %c0_i32 = arith.constant 0 : i32
    %c0_i32_0 = arith.constant 0 : i32
    return %arg0, %c0_i32 : i32, i32
  }
}

</mosaic_0001>

<bundles_post_ra>
// kernel: branch_1_fun.1
= control target key start
LH: loop header
LB: loop body
LE: loop exit
PB: predicated region body
PF: predicated region fallthrough
CT: control target
= control target key end

     0   :  { %s999_s9 = smov 0   ;;  %s1642_s0 = inlined_call_operand.vmem [shape: f32[64,400], index: 0, kind: input, shape index: {}, may-alias: {0,2}]   ;;  %s1643_s1 = inlined_call_operand.vmem [shape: f32[400,400], index: 1, kind: input, shape index: {}]   ;;  %s1644_s2 = inlined_call_operand.vmem [shape: f32[64,400], index: 2, kind: output, shape index: {}, may-alias: {0,2}]  }
   0x1 LB: > { %s741_s10 = sadd.s32 4294967295, %s982_s9   ;;  %p745_p0 = scmp.ge.s32.totalorder %s982_s9, 1  ;;  %s982_s9 = sphi %s999_s9, %s12_s9  }
   0x2   : > { %p114_p1 = scmp.lt.s32.totalorder %s982_s9, 5 }
   0x4   : > { %p115_p2 = pnand %p745_p0, %p114_p1 }
   0x5   : > { %v161_v0 = vld [vmem:[%s1643_s1 + $0x8] sm:$0xff] (!%p115_p2)  ;;  %v163_v2 = vld [vmem:[%s1643_s1 + $0x18] sm:$0xff] (!%p115_p2)  ;;  %v160_v5 = vld [vmem:[%s1643_s1] sm:$0xff] (!%p115_p2)  ;;  %s746_s5 = sshll.u32 (!%p115_p2), %s741_s10, 1  ;;  %vm360_vm0 = vcmask (!%p115_p2), 130048  }
   0x6   : > { %118 = sbr.rel (%p115_p2) target bundleno = 328 (0x148), region = 28  ;;  %v165_v1 = vld [vmem:[%s1643_s1 + $0x28] sm:$0xff] (!%p115_p2)  ;;  %v167_v4 = vld [vmem:[%s1643_s1 + $0x38] sm:$0xff] (!%p115_p2)  ;;  %v164_v6 = vld [vmem:[%s1643_s1 + $0x20] sm:$0xff] (!%p115_p2)  ;;  %p139_p3 = scmp.lt.s32.totalorder (!%p115_p2), %s746_s5, 7 }
   0x7   : > { %v760_v3 = vpack.c.bf16 (!%p115_p2), %v165_v1, %v161_v0  ;;  %v860_v7 = vpack.c.bf16 (!%p115_p2), %v167_v4, %v163_v2  ;;  %v762_v8 = vpack.c.bf16 (!%p115_p2), %v164_v6, %v160_v5  ;;  %v162_v9 = vld [vmem:[%s1643_s1 + $0x10] sm:$0xff] (!%p115_p2)  ;;  %v169_v11 = vld [vmem:[%s1643_s1 + $0x48] sm:$0xff] (!%p115_p2)  ;;  %v171_v14 = vld [vmem:[%s1643_s1 + $0x58] sm:$0xff] (!%p115_p2) }
   0x8   : > { %v166_v10 = vld [vmem:[%s1643_s1 + $0x30] sm:$0xff] (!%p115_p2)  ;;  %v173_v13 = vld [vmem:[%s1643_s1 + $0x68] sm:$0xff] (!%p115_p2)  ;;  %v175_v15 = vld [vmem:[%s1643_s1 + $0x78] sm:$0xff] (!%p115_p2) }
   0x9   : > { %761 = vmatprep.subr.bf16.mxu0 (!%p115_p2), %v760_v3  ;;  %v862_v12 = vpack.c.bf16 (!%p115_p2), %v166_v10, %v162_v9  ;;  %861 = vmatprep.subr.bf16.mxu1 (!%p115_p2), %v860_v7  ;;  %v764_v16 = vpack.c.bf16 (!%p115_p2), %v173_v13, %v169_v11  ;;  %v864_v17 = vpack.c.bf16 (!%p115_p2), %v175_v15, %v171_v14  ;;  %v168_v18 = vld [vmem:[%s1643_s1 + $0x40] sm:$0xff] (!%p115_p2)  ;;  %v170_v20 = vld [vmem:[%s1643_s1 + $0x50] sm:$0xff] (!%p115_p2)  ;;  %v177_v23 = vld [vmem:[%s1643_s1 + $0x88] sm:$0xff] (!%p115_p2) }
   0xa   : > { %763 = vmatpush1.bf16.msra.mxu0 (!%p115_p2), %v762_v8  ;;  %v172_v19 = vld [vmem:[%s1643_s1 + $0x60] sm:$0xff] (!%p115_p2)  ;;  %v174_v22 = vld [vmem:[%s1643_s1 + $0x70] sm:$0xff] (!%p115_p2)  ;;  %v181_v24 = vld [vmem:[%s1643_s1 + $0xa8] sm:$0xff] (!%p115_p2) }
   0xb   : > { %863 = vmatpush1.bf16.msra.mxu1 (!%p115_p2), %v862_v12  ;;  %v766_v21 = vpack.c.bf16 (!%p115_p2), %v172_v19, %v168_v18  ;;  %765 = vmatprep.subr.bf16.mxu0 (!%p115_p2), %v764_v16  ;;  %v866_v25 = vpack.c.bf16 (!%p115_p2), %v174_v22, %v170_v20  ;;  %v768_v26 = vpack.c.bf16 (!%p115_p2), %v181_v24, %v177_v23  ;;  %v179_v27 = vld [vmem:[%s1643_s1 + $0x98] sm:$0xff] (!%p115_p2)  ;;  %v176_v29 = vld [vmem:[%s1643_s1 + $0x80] sm:$0xff] (!%p115_p2)  ;;  %v178_v32 = vld [vmem:[%s1643_s1 + $0x90] sm:$0xff] (!%p115_p2) }
   0xc   : > { %865 = vmatprep.subr.bf16.mxu1 (!%p115_p2), %v864_v17  ;;  %v183_v28 = vld [vmem:[%s1643_s1 + $0xb8] sm:$0xff] (!%p115_p2)  ;;  %v180_v31 = vld [vmem:[%s1643_s1 + $0xa0] sm:$0xff] (!%p115_p2)  ;;  %v182_v33 = vld [vmem:[%s1643_s1 + $0xb0] sm:$0xff] (!%p115_p2) }
   0xd   : > { %v868_v30 = vpack.c.bf16 %v183_v28, %v179_v27  ;;  %v770_v34 = vpack.c.bf16 %v180_v31, %v176_v29  ;;  %v185_v35 = vld [vmem:[%s1643_s1 + $0xc8] sm:$0xff]  ;;  %v187_v37 = vld [vmem:[%s1643_s1 + $0xd8] sm:$0xff]  ;;  %v870_v38 = vpack.c.bf16 %v182_v33, %v178_v32  ;;  %v184_v41 = vld [vmem:[%s1643_s1 + $0xc0] sm:$0xff]  ;;  %s1646_s5 = smov (!%p139_p3, %s746_s5), 7 }
   0xe   : > { %767 = vmatpush1.bf16.msra.mxu0 %v766_v21  ;;  %v189_v36 = vld [vmem:[%s1643_s1 + $0xe8] sm:$0xff]  ;;  %v191_v40 = vld [vmem:[%s1643_s1 + $0xf8] sm:$0xff]  ;;  %v188_v42 = vld [vmem:[%s1643_s1 + $0xe0] sm:$0xff]  ;;  %s758_s23 = sshll.u32 %s1646_s5, 5 }
   0xf   : > { %867 = vmatpush1.bf16.msra.mxu1 %v866_v25  ;;  %769 = vmatprep.subr.bf16.mxu0 %v768_v26  ;;  %v772_v39 = vpack.c.bf16 %v189_v36, %v185_v35  ;;  %v872_v43 = vpack.c.bf16 %v191_v40, %v187_v37  ;;  %v186_v44 = vld [vmem:[%s1643_s1 + $0xd0] sm:$0xff]  ;;  %v193_v46 = vld [vmem:[%s1643_s1 + $0x108] sm:$0xff]  ;;  %v195_v48 = vld [vmem:[%s1643_s1 + $0x118] sm:$0xff]  ;;  %v774_v50 = vpack.c.bf16 %v188_v42, %v184_v41  ;;  %s1294_s10 = scalar_lea.vmem %s1642_s0, %s758_s23  ;;  %s150_s19 = scalar_lea.vmem %s1644_s2, %s758_s23 }
  0x10   : > { %869 = vmatprep.subr.bf16.mxu1 %v868_v30  ;;  %v190_v45 = vld [vmem:[%s1643_s1 + $0xf0] sm:$0xff]  ;;  %v197_v47 = vld [vmem:[%s1643_s1 + $0x128] sm:$0xff]  ;;  %v199_v49 = vld [vmem:[%s1643_s1 + $0x138] sm:$0xff] }
  0x11   : > { %v874_v51 = vpack.c.bf16 %v190_v45, %v186_v44  ;;  %v776_v52 = vpack.c.bf16 %v197_v47, %v193_v46  ;;  %v192_v53 = vld [vmem:[%s1643_s1 + $0x100] sm:$0xff]  ;;  %v194_v55 = vld [vmem:[%s1643_s1 + $0x110] sm:$0xff]  ;;  %v876_v56 = vpack.c.bf16 %v199_v49, %v195_v48  ;;  %v201_v58 = vld [vmem:[%s1643_s1 + $0x148] sm:$0xff] }
  0x12   : > { %771 = vmatpush1.bf16.msra.mxu0 %v770_v34  ;;  %v196_v54 = vld [vmem:[%s1643_s1 + $0x120] sm:$0xff]  ;;  %v198_v57 = vld [vmem:[%s1643_s1 + $0x130] sm:$0xff]  ;;  %v205_v59 = vld [vmem:[%s1643_s1 + $0x168] sm:$0xff] }
  0x13   : > { %871 = vmatpush1.bf16.msra.mxu1 %v870_v38  ;;  %773 = vmatprep.subr.bf16.mxu0 %v772_v39  ;;  %v203_v60 = vld [vmem:[%s1643_s1 + $0x158] sm:$0xff]  ;;  %v778_v62 = vpack.c.bf16 %v196_v54, %v192_v53  ;;  %v878_v63 = vpack.c.bf16 %v198_v57, %v194_v55  ;;  %v780_v0 = vpack.c.bf16 %v205_v59, %v201_v58  ;;  %v200_v1 = vld [vmem:[%s1643_s1 + $0x140] sm:$0xff]  ;;  %v202_v3 = vld [vmem:[%s1643_s1 + $0x150] sm:$0xff] }
  0x14   : > { %873 = vmatprep.subr.bf16.mxu1 %v872_v43  ;;  %v207_v61 = vld [vmem:[%s1643_s1 + $0x178] sm:$0xff]  ;;  %v204_v2 = vld [vmem:[%s1643_s1 + $0x160] sm:$0xff]  ;;  %v206_v5 = vld [vmem:[%s1643_s1 + $0x170] sm:$0xff] }
  0x15   : > { %v880_v4 = vpack.c.bf16 %v207_v61, %v203_v60  ;;  %v209_v6 = vld [vmem:[%s1643_s1 + $0x188] sm:$0xff]  ;;  %v211_v8 = vld [vmem:[%s1643_s1 + $0x198] sm:$0xff]  ;;  %v782_v10 = vpack.c.bf16 %v204_v2, %v200_v1  ;;  %v882_v11 = vpack.c.bf16 %v206_v5, %v202_v3  ;;  %v208_v13 = vld [vmem:[%s1643_s1 + $0x180] sm:$0xff] }
  0x16   : > { %775 = vmatpush1.bf16.msra.mxu0 %v774_v50  ;;  %v213_v7 = vld [vmem:[%s1643_s1 + $0x1a8] sm:$0xff]  ;;  %v215_v9 = vld [vmem:[%s1643_s1 + $0x1b8] sm:$0xff]  ;;  %v212_v14 = vld [vmem:[%s1643_s1 + $0x1a0] sm:$0xff] }
  0x17   : > { %875 = vmatpush1.bf16.msra.mxu1 %v874_v51  ;;  %777 = vmatprep.subr.bf16.mxu0 %v776_v52  ;;  %v784_v12 = vpack.c.bf16 %v213_v7, %v209_v6  ;;  %v210_v15 = vld [vmem:[%s1643_s1 + $0x190] sm:$0xff]  ;;  %v884_v16 = vpack.c.bf16 %v215_v9, %v211_v8  ;;  %v217_v18 = vld [vmem:[%s1643_s1 + $0x1c8] sm:$0xff]  ;;  %v219_v20 = vld [vmem:[%s1643_s1 + $0x1d8] sm:$0xff]  ;;  %v786_v22 = vpack.c.bf16 %v212_v14, %v208_v13 }
  0x18   : > { %877 = vmatprep.subr.bf16.mxu1 %v876_v56  ;;  %v214_v17 = vld [vmem:[%s1643_s1 + $0x1b0] sm:$0xff]  ;;  %v221_v19 = vld [vmem:[%s1643_s1 + $0x1e8] sm:$0xff]  ;;  %v223_v21 = vld [vmem:[%s1643_s1 + $0x1f8] sm:$0xff] }
  0x19   : > { %v886_v23 = vpack.c.bf16 %v214_v17, %v210_v15  ;;  %v788_v24 = vpack.c.bf16 %v221_v19, %v217_v18  ;;  %v216_v25 = vld [vmem:[%s1643_s1 + $0x1c0] sm:$0xff]  ;;  %v218_v27 = vld [vmem:[%s1643_s1 + $0x1d0] sm:$0xff]  ;;  %v888_v28 = vpack.c.bf16 %v223_v21, %v219_v20  ;;  %v225_v30 = vld [vmem:[%s1643_s1 + $0x208] sm:$0xff] }
  0x1a   : > { %779 = vmatpush1.bf16.msra.mxu0 %v778_v62  ;;  %v220_v26 = vld [vmem:[%s1643_s1 + $0x1e0] sm:$0xff]  ;;  %v222_v29 = vld [vmem:[%s1643_s1 + $0x1f0] sm:$0xff]  ;;  %v229_v31 = vld [vmem:[%s1643_s1 + $0x228] sm:$0xff] }
  0x1b   : > { %879 = vmatpush1.bf16.msra.mxu1 %v878_v63  ;;  %781 = vmatprep.subr.bf16.mxu0 %v780_v0  ;;  %v227_v32 = vld [vmem:[%s1643_s1 + $0x218] sm:$0xff]  ;;  %v790_v34 = vpack.c.bf16 %v220_v26, %v216_v25  ;;  %v890_v35 = vpack.c.bf16 %v222_v29, %v218_v27  ;;  %v792_v36 = vpack.c.bf16 %v229_v31, %v225_v30  ;;  %v224_v37 = vld [vmem:[%s1643_s1 + $0x200] sm:$0xff]  ;;  %v226_v39 = vld [vmem:[%s1643_s1 + $0x210] sm:$0xff] }
  0x1c   : > { %881 = vmatprep.subr.bf16.mxu1 %v880_v4  ;;  %v231_v33 = vld [vmem:[%s1643_s1 + $0x238] sm:$0xff]  ;;  %v228_v38 = vld [vmem:[%s1643_s1 + $0x220] sm:$0xff]  ;;  %v230_v41 = vld [vmem:[%s1643_s1 + $0x230] sm:$0xff] }
  0x1d   : > { %v892_v40 = vpack.c.bf16 %v231_v33, %v227_v32  ;;  %v233_v42 = vld [vmem:[%s1643_s1 + $0x248] sm:$0xff]  ;;  %v235_v44 = vld [vmem:[%s1643_s1 + $0x258] sm:$0xff]  ;;  %v794_v46 = vpack.c.bf16 %v228_v38, %v224_v37  ;;  %v894_v47 = vpack.c.bf16 %v230_v41, %v226_v39  ;;  %v232_v49 = vld [vmem:[%s1643_s1 + $0x240] sm:$0xff] }
  0x1e   : > { %783 = vmatpush1.bf16.msra.mxu0 %v782_v10  ;;  %v237_v43 = vld [vmem:[%s1643_s1 + $0x268] sm:$0xff]  ;;  %v239_v45 = vld [vmem:[%s1643_s1 + $0x278] sm:$0xff]  ;;  %v236_v50 = vld [vmem:[%s1643_s1 + $0x260] sm:$0xff] }
  0x1f   : > { %883 = vmatpush1.bf16.msra.mxu1 %v882_v11  ;;  %785 = vmatprep.subr.bf16.mxu0 %v784_v12  ;;  %v796_v48 = vpack.c.bf16 %v237_v43, %v233_v42  ;;  %v234_v51 = vld [vmem:[%s1643_s1 + $0x250] sm:$0xff]  ;;  %v896_v52 = vpack.c.bf16 %v239_v45, %v235_v44  ;;  %v241_v54 = vld [vmem:[%s1643_s1 + $0x288] sm:$0xff]  ;;  %v243_v56 = vld [vmem:[%s1643_s1 + $0x298] sm:$0xff]  ;;  %v798_v58 = vpack.c.bf16 %v236_v50, %v232_v49 }
  0x20   : > { %885 = vmatprep.subr.bf16.mxu1 %v884_v16  ;;  %v238_v53 = vld [vmem:[%s1643_s1 + $0x270] sm:$0xff]  ;;  %v245_v55 = vld [vmem:[%s1643_s1 + $0x2a8] sm:$0xff]  ;;  %v247_v57 = vld [vmem:[%s1643_s1 + $0x2b8] sm:$0xff] }
  0x21   : > { %v898_v59 = vpack.c.bf16 %v238_v53, %v234_v51  ;;  %v800_v60 = vpack.c.bf16 %v245_v55, %v241_v54  ;;  %v240_v61 = vld [vmem:[%s1643_s1 + $0x280] sm:$0xff]  ;;  %v242_v63 = vld [vmem:[%s1643_s1 + $0x290] sm:$0xff]  ;;  %v900_v0 = vpack.c.bf16 %v247_v57, %v243_v56  ;;  %v249_v2 = vld [vmem:[%s1643_s1 + $0x2c8] sm:$0xff] }
  0x22   : > { %787 = vmatpush1.bf16.msra.mxu0 %v786_v22  ;;  %v244_v62 = vld [vmem:[%s1643_s1 + $0x2a0] sm:$0xff]  ;;  %v246_v1 = vld [vmem:[%s1643_s1 + $0x2b0] sm:$0xff]  ;;  %v253_v3 = vld [vmem:[%s1643_s1 + $0x2e8] sm:$0xff] }
  0x23   : > { %887 = vmatpush1.bf16.msra.mxu1 %v886_v23  ;;  %789 = vmatprep.subr.bf16.mxu0 %v788_v24  ;;  %v251_v4 = vld [vmem:[%s1643_s1 + $0x2d8] sm:$0xff]  ;;  %v802_v6 = vpack.c.bf16 %v244_v62, %v240_v61  ;;  %v248_v7 = vld [vmem:[%s1643_s1 + $0x2c0] sm:$0xff]  ;;  %v902_v8 = vpack.c.bf16 %v246_v1, %v242_v63  ;;  %v804_v9 = vpack.c.bf16 %v253_v3, %v249_v2  ;;  %v250_v11 = vld [vmem:[%s1643_s1 + $0x2d0] sm:$0xff] }
  0x24   : > { %889 = vmatprep.subr.bf16.mxu1 %v888_v28  ;;  %v255_v5 = vld [vmem:[%s1643_s1 + $0x2f8] sm:$0xff]  ;;  %v252_v10 = vld [vmem:[%s1643_s1 + $0x2e0] sm:$0xff]  ;;  %v254_v12 = vld [vmem:[%s1643_s1 + $0x2f0] sm:$0xff] }
  0x25   : > { %v904_v13 = vpack.c.bf16 %v255_v5, %v251_v4  ;;  %v257_v14 = vld [vmem:[%s1643_s1 + $0x308] sm:$0xff]  ;;  %v259_v17 = vld [vmem:[%s1643_s1 + $0x318] sm:$0xff]  ;;  %v806_v19 = vpack.c.bf16 %v252_v10, %v248_v7  ;;  %v906_v20 = vpack.c.bf16 %v254_v12, %v250_v11  ;;  %v256_v22 = vld [vmem:[%s1643_s1 + $0x300] sm:$0xff] }
  0x26   : > { %791 = vmatpush1.bf16.msra.mxu0 %v790_v34  ;;  %v261_v15 = vld [vmem:[%s1643_s1 + $0x328] sm:$0xff]  ;;  %v263_v18 = vld [vmem:[%s1643_s1 + $0x338] sm:$0xff]  ;;  %v260_v23 = vld [vmem:[%s1643_s1 + $0x320] sm:$0xff] }
  0x27   : > { %891 = vmatpush1.bf16.msra.mxu1 %v890_v35  ;;  %793 = vmatprep.subr.bf16.mxu0 %v792_v36  ;;  %v153_v16 = vld [vmem:[%s1294_s10 + $0x8] sm:$0xff]  ;;  %v808_v21 = vpack.c.bf16 %v261_v15, %v257_v14  ;;  %v258_v24 = vld [vmem:[%s1643_s1 + $0x310] sm:$0xff]  ;;  %v908_v25 = vpack.c.bf16 %v263_v18, %v259_v17  ;;  %v267_v29 = vld [vmem:[%s1643_s1 + $0x358] sm:$0xff]  ;;  %v810_v31 = vpack.c.bf16 %v260_v23, %v256_v22 }
  0x28   : > { %893 = vmatprep.subr.bf16.mxu1 %v892_v40  ;;  %431 = vmatprep.mubr.f32.mxu0 %v153_v16  ;;  %v262_v26 = vld [vmem:[%s1643_s1 + $0x330] sm:$0xff]  ;;  %v265_v27 = vld [vmem:[%s1643_s1 + $0x348] sm:$0xff]  ;;  %v271_v30 = vld [vmem:[%s1643_s1 + $0x378] sm:$0xff] }
  0x29   : > { %585 = vmatprep.mubr.f32.mxu1 %v153_v16  ;;  %v269_v28 = vld [vmem:[%s1643_s1 + $0x368] sm:$0xff]  ;;  %v910_v32 = vpack.c.bf16 %v262_v26, %v258_v24  ;;  %v264_v34 = vld [vmem:[%s1643_s1 + $0x340] sm:$0xff]  ;;  %v266_v36 = vld [vmem:[%s1643_s1 + $0x350] sm:$0xff]  ;;  %v912_v37 = vpack.c.bf16 %v271_v30, %v267_v29 }
  0x2a   : > { %795 = vmatpush1.bf16.msra.mxu0 %v794_v46  ;;  %v812_v33 = vpack.c.bf16 %v269_v28, %v265_v27  ;;  %v268_v35 = vld [vmem:[%s1643_s1 + $0x360] sm:$0xff]  ;;  %v270_v38 = vld [vmem:[%s1643_s1 + $0x370] sm:$0xff]  ;;  %v273_v39 = vld [vmem:[%s1643_s1 + $0x388] sm:$0xff] }
  0x2b   : > { %895 = vmatpush1.bf16.msra.mxu1 %v894_v47  ;;  %797 = vmatprep.subr.bf16.mxu0 %v796_v48  ;;  %v277_v40 = vld [vmem:[%s1643_s1 + $0x3a8] sm:$0xff]  ;;  %v275_v41 = vld [vmem:[%s1643_s1 + $0x398] sm:$0xff]  ;;  %v814_v43 = vpack.c.bf16 %v268_v35, %v264_v34  ;;  %v914_v44 = vpack.c.bf16 %v270_v38, %v266_v36  ;;  %v272_v46 = vld [vmem:[%s1643_s1 + $0x380] sm:$0xff] }
  0x2c   : > { %897 = vmatprep.subr.bf16.mxu1 %v896_v52  ;;  %v279_v42 = vld [vmem:[%s1643_s1 + $0x3b8] sm:$0xff]  ;;  %v816_v45 = vpack.c.bf16 %v277_v40, %v273_v39  ;;  %v276_v47 = vld [vmem:[%s1643_s1 + $0x3a0] sm:$0xff]  ;;  %v274_v48 = vld [vmem:[%s1643_s1 + $0x390] sm:$0xff] }
  0x2d   : > { %v916_v49 = vpack.c.bf16 %v279_v42, %v275_v41  ;;  %v278_v50 = vld [vmem:[%s1643_s1 + $0x3b0] sm:$0xff]  ;;  %v281_v51 = vld [vmem:[%s1643_s1 + $0x3c8] sm:$0xff]  ;;  %v283_v53 = vld [vmem:[%s1643_s1 + $0x3d8] sm:$0xff]  ;;  %v818_v55 = vpack.c.bf16 %v276_v47, %v272_v46 }
  0x2e   : > { %799 = vmatpush1.bf16.msra.mxu0 %v798_v58  ;;  %v285_v52 = vld [vmem:[%s1643_s1 + $0x3e8] sm:$0xff]  ;;  %v287_v54 = vld [vmem:[%s1643_s1 + $0x3f8] sm:$0xff]  ;;  %v918_v56 = vpack.c.bf16 %v278_v50, %v274_v48  ;;  %v280_v58 = vld [vmem:[%s1643_s1 + $0x3c0] sm:$0xff] }
  0x2f   : > { %899 = vmatpush1.bf16.msra.mxu1 %v898_v59  ;;  %801 = vmatprep.subr.bf16.mxu0 %v800_v60  ;;  %v820_v57 = vpack.c.bf16 %v285_v52, %v281_v51  ;;  %v284_v59 = vld [vmem:[%s1643_s1 + $0x3e0] sm:$0xff]  ;;  %v282_v60 = vld [vmem:[%s1643_s1 + $0x3d0] sm:$0xff]  ;;  %v920_v61 = vpack.c.bf16 %v287_v54, %v283_v53  ;;  %v289_v63 = vld [vmem:[%s1643_s1 + $0x408] sm:$0xff] }
  0x30   : > { %901 = vmatprep.subr.bf16.mxu1 %v900_v0  ;;  %v286_v62 = vld [vmem:[%s1643_s1 + $0x3f0] sm:$0xff]  ;;  %v293_v0 = vld [vmem:[%s1643_s1 + $0x428] sm:$0xff]  ;;  %v291_v1 = vld [vmem:[%s1643_s1 + $0x418] sm:$0xff]  ;;  %v822_v3 = vpack.c.bf16 %v284_v59, %v280_v58 }
  0x31   : > { %v295_v2 = vld [vmem:[%s1643_s1 + $0x438] sm:$0xff]  ;;  %v922_v4 = vpack.c.bf16 %v286_v62, %v282_v60  ;;  %v824_v5 = vpack.c.bf16 %v293_v0, %v289_v63  ;;  %v292_v7 = vld [vmem:[%s1643_s1 + $0x420] sm:$0xff]  ;;  %v294_v10 = vld [vmem:[%s1643_s1 + $0x430] sm:$0xff] }
  0x32   : > { %803 = vmatpush1.bf16.msra.mxu0 %v802_v6  ;;  %v288_v6 = vld [vmem:[%s1643_s1 + $0x400] sm:$0xff]  ;;  %v297_v11 = vld [vmem:[%s1643_s1 + $0x448] sm:$0xff]  ;;  %v303_v14 = vld [vmem:[%s1643_s1 + $0x478] sm:$0xff] }
  0x33   : > { %903 = vmatpush1.bf16.msra.mxu1 %v902_v8  ;;  %805 = vmatprep.subr.bf16.mxu0 %v804_v9  ;;  %v290_v8 = vld [vmem:[%s1643_s1 + $0x410] sm:$0xff]  ;;  %v924_v9 = vpack.c.bf16 %v295_v2, %v291_v1  ;;  %v301_v12 = vld [vmem:[%s1643_s1 + $0x468] sm:$0xff]  ;;  %v152_v15 = vld [vmem:[%s1294_s10] sm:$0xff]  ;;  %v826_v16 = vpack.c.bf16 %v292_v7, %v288_v6 }
  0x34   : > { %905 = vmatprep.subr.bf16.mxu1 %v904_v13  ;;  %v299_v13 = vld [vmem:[%s1643_s1 + $0x458] sm:$0xff]  ;;  %v926_v17 = vpack.c.bf16 %v294_v10, %v290_v8  ;;  %v828_v18 = vpack.c.bf16 %v301_v12, %v297_v11  ;;  %v302_v23 = vld [vmem:[%s1643_s1 + $0x470] sm:$0xff]  ;;  %v305_v24 = vld [vmem:[%s1643_s1 + $0x488] sm:$0xff] }
  0x35   : > { %v928_v22 = vpack.c.bf16 %v303_v14, %v299_v13  ;;  %v307_v26 = vld [vmem:[%s1643_s1 + $0x498] sm:$0xff]  ;;  %v157_v28 = vld [vmem:[%s1294_s10 + $0x28] sm:$0xff]  ;;  %v156_v30 = vld [vmem:[%s1294_s10 + $0x20] sm:$0xff] }
  0x36   : > { %807 = vmatpush1.bf16.msra.mxu0 %v806_v19  ;;  %v296_v19 = vld [vmem:[%s1643_s1 + $0x440] sm:$0xff]  ;;  %v311_v27 = vld [vmem:[%s1643_s1 + $0x4b8] sm:$0xff]  ;;  %v306_v35 = vld [vmem:[%s1643_s1 + $0x490] sm:$0xff] }
  0x37   : > { %907 = vmatpush1.bf16.msra.mxu1 %v906_v20  ;;  %809 = vmatprep.subr.bf16.mxu0 %v808_v21  ;;  %v300_v20 = vld [vmem:[%s1643_s1 + $0x460] sm:$0xff]  ;;  %v298_v21 = vld [vmem:[%s1643_s1 + $0x450] sm:$0xff]  ;;  %v932_v36 = vpack.c.bf16 %v311_v27, %v307_v26  ;;  %v313_v38 = vld [vmem:[%s1643_s1 + $0x4c8] sm:$0xff] }
  0x38   : > { %909 = vmatprep.subr.bf16.mxu1 %v908_v25  ;;  %v309_v25 = vld [vmem:[%s1643_s1 + $0x4a8] sm:$0xff]  ;;  %v830_v29 = vpack.c.bf16 %v300_v20, %v296_v19  ;;  %v308_v34 = vld [vmem:[%s1643_s1 + $0x4a0] sm:$0xff]  ;;  %v315_v40 = vld [vmem:[%s1643_s1 + $0x4d8] sm:$0xff] }
  0x39   : > { %v317_v39 = vld [vmem:[%s1643_s1 + $0x4e8] sm:$0xff]  ;;  %v319_v41 = vld [vmem:[%s1643_s1 + $0x4f8] sm:$0xff]  ;;  %v312_v46 = vld [vmem:[%s1643_s1 + $0x4c0] sm:$0xff] }
  0x3a   : > { %811 = vmatpush1.bf16.msra.mxu0 %v810_v31  ;;  %v930_v31 = vpack.c.bf16 %v302_v23, %v298_v21  ;;  %v155_v42 = vld [vmem:[%s1294_s10 + $0x18] sm:$0xff]  ;;  %v316_v47 = vld [vmem:[%s1643_s1 + $0x4e0] sm:$0xff]  ;;  %v314_v48 = vld [vmem:[%s1643_s1 + $0x4d0] sm:$0xff] }
  0x3b   : > { %911 = vmatpush1.bf16.msra.mxu1 %v910_v32  ;;  %813 = vmatprep.subr.bf16.mxu0 %v812_v33  ;;  %v832_v32 = vpack.c.bf16 %v309_v25, %v305_v24  ;;  %v304_v33 = vld [vmem:[%s1643_s1 + $0x480] sm:$0xff]  ;;  %v318_v50 = vld [vmem:[%s1643_s1 + $0x4f0] sm:$0xff]  ;;  %v321_v51 = vld [vmem:[%s1643_s1 + $0x508] sm:$0xff] }
  0x3c   : > { %913 = vmatprep.subr.bf16.mxu1 %v912_v37  ;;  %v310_v37 = vld [vmem:[%s1643_s1 + $0x4b0] sm:$0xff]  ;;  %v325_v52 = vld [vmem:[%s1643_s1 + $0x528] sm:$0xff]  ;;  %v323_v53 = vld [vmem:[%s1643_s1 + $0x518] sm:$0xff] }
  0x3d   : > { %v327_v54 = vld [vmem:[%s1643_s1 + $0x538] sm:$0xff]  ;;  %v320_v58 = vld [vmem:[%s1643_s1 + $0x500] sm:$0xff]  ;;  %v322_v60 = vld [vmem:[%s1643_s1 + $0x510] sm:$0xff] }
  0x3e   : > { %815 = vmatpush1.bf16.msra.mxu0 %v814_v43  ;;  %v834_v43 = vpack.c.bf16 %v308_v34, %v304_v33  ;;  %v324_v59 = vld [vmem:[%s1643_s1 + $0x520] sm:$0xff]  ;;  %v326_v62 = vld [vmem:[%s1643_s1 + $0x530] sm:$0xff]  ;;  %v329_v63 = vld [vmem:[%s1643_s1 + $0x548] sm:$0xff] }
  0x3f   : > { %915 = vmatpush1.bf16.msra.mxu1 %v914_v44  ;;  %817 = vmatprep.subr.bf16.mxu0 %v816_v45  ;;  %v934_v44 = vpack.c.bf16 %v310_v37, %v306_v35  ;;  %v836_v45 = vpack.c.bf16 %v317_v39, %v313_v38  ;;  %v333_v0 = vld [vmem:[%s1643_s1 + $0x568] sm:$0xff]  ;;  %v331_v1 = vld [vmem:[%s1643_s1 + $0x558] sm:$0xff]  ;;  %v328_v6 = vld [vmem:[%s1643_s1 + $0x540] sm:$0xff] }
  0x40   : > { %917 = vmatprep.subr.bf16.mxu1 %v916_v49  ;;  %v936_v49 = vpack.c.bf16 %v319_v41, %v315_v40  ;;  %v335_v2 = vld [vmem:[%s1643_s1 + $0x578] sm:$0xff]  ;;  %v332_v7 = vld [vmem:[%s1643_s1 + $0x560] sm:$0xff]  ;;  %v330_v8 = vld [vmem:[%s1643_s1 + $0x550] sm:$0xff] }
  0x41   : > { %v334_v10 = vld [vmem:[%s1643_s1 + $0x570] sm:$0xff]  ;;  %v337_v11 = vld [vmem:[%s1643_s1 + $0x588] sm:$0xff]  ;;  %v339_v13 = vld [vmem:[%s1643_s1 + $0x598] sm:$0xff] }
  0x42   : > { %819 = vmatpush1.bf16.msra.mxu0 %v818_v55  ;;  %v838_v55 = vpack.c.bf16 %v316_v47, %v312_v46  ;;  %v341_v12 = vld [vmem:[%s1643_s1 + $0x5a8] sm:$0xff]  ;;  %v343_v14 = vld [vmem:[%s1643_s1 + $0x5b8] sm:$0xff]  ;;  %v340_v19 = vld [vmem:[%s1643_s1 + $0x5a0] sm:$0xff] }
  0x43   : > { %919 = vmatpush1.bf16.msra.mxu1 %v918_v56  ;;  %821 = vmatprep.subr.bf16.mxu0 %v820_v57  ;;  %v938_v56 = vpack.c.bf16 %v318_v50, %v314_v48  ;;  %v840_v57 = vpack.c.bf16 %v325_v52, %v321_v51  ;;  %v338_v20 = vld [vmem:[%s1643_s1 + $0x590] sm:$0xff]  ;;  %v948_v21 = vpack.c.bf16 %v343_v14, %v339_v13  ;;  %v345_v23 = vld [vmem:[%s1643_s1 + $0x5c8] sm:$0xff]  ;;  %v347_v25 = vld [vmem:[%s1643_s1 + $0x5d8] sm:$0xff] }
  0x44   : > { %921 = vmatprep.subr.bf16.mxu1 %v920_v61  ;;  %v940_v61 = vpack.c.bf16 %v327_v54, %v323_v53  ;;  %v349_v24 = vld [vmem:[%s1643_s1 + $0x5e8] sm:$0xff]  ;;  %v351_v26 = vld [vmem:[%s1643_s1 + $0x5f8] sm:$0xff]  ;;  %v350_v34 = vld [vmem:[%s1643_s1 + $0x5f0] sm:$0xff] }
  0x45   : > { %v952_v33 = vpack.c.bf16 %v351_v26, %v347_v25  ;;  %v353_v35 = vld [vmem:[%s1643_s1 + $0x608] sm:$0xff]  ;;  %v355_v37 = vld [vmem:[%s1643_s1 + $0x618] sm:$0xff]  ;;  %v358_v46 = vld [vmem:[%s1643_s1 + $0x630] sm:$0xff] }
  0x46   : > { %823 = vmatpush1.bf16.msra.mxu0 %v822_v3  ;;  %v842_v3 = vpack.c.bf16 %v324_v59, %v320_v58  ;;  %v359_v38 = vld [vmem:[%s1643_s1 + $0x638] sm:$0xff]  ;;  %v158_v51 = vld [vmem:[%s1294_s10 + $0x30] sm:$0xff] }
  0x47   : > { %923 = vmatpush1.bf16.msra.mxu1 %v922_v4  ;;  %825 = vmatprep.subr.bf16.mxu0 %v824_v5  ;;  %v942_v4 = vpack.c.bf16 %v326_v62, %v322_v60  ;;  %v844_v5 = vpack.c.bf16 %v333_v0, %v329_v63  ;;  %v159_v50 = vld [vmem:[%s1294_s10 + $0x38] sm:$0xff] }
  0x48   : > { %925 = vmatprep.subr.bf16.mxu1 %v924_v9  ;;  %v944_v9 = vpack.c.bf16 %v335_v2, %v331_v1 }
  0x49   : > { %432 = vmatmul.mubr.f32.vlgmr.msra.gmra.mrb[0].mxu0 %v152_v15 }
  0x4a   : > { %827 = vmatpush1.bf16.msra.mxu0 %v826_v16  ;;  %586 = vmatmul.mubr.f32.vlgmr.msra.gmra.mrb[0].mxu1 %v152_v15  ;;  %v846_v15 = vpack.c.bf16 %v332_v7, %v328_v6  ;;  %v946_v16 = vpack.c.bf16 %v334_v10, %v330_v8 }
  0x4b   : > { %927 = vmatpush1.bf16.msra.mxu1 %v926_v17  ;;  %829 = vmatprep.subr.bf16.mxu0 %v828_v18  ;;  %v848_v17 = vpack.c.bf16 %v341_v12, %v337_v11  ;;  %v336_v18 = vld [vmem:[%s1643_s1 + $0x580] sm:$0xff] }
  0x4c   : > { %929 = vmatprep.subr.bf16.mxu1 %v928_v22  ;;  %437 = vmatprep.mubr.f32.mxu0 %v157_v28  ;;  %v342_v22 = vld [vmem:[%s1643_s1 + $0x5b0] sm:$0xff]  ;;  %v850_v27 = vpack.c.bf16 %v340_v19, %v336_v18 }
  0x4d   : > { %591 = vmatprep.mubr.f32.mxu1 %v157_v28  ;;  %438 = vmatmul.mubr.f32.gmra.mrb[2].mxu0 %v156_v30  ;;  %v950_v28 = vpack.c.bf16 %v342_v22, %v338_v20 }
  0x4e   : > { %831 = vmatpush1.bf16.msra.mxu0 %v830_v29  ;;  %592 = vmatmul.mubr.f32.gmra.mrb[2].mxu1 %v156_v30  ;;  %v852_v29 = vpack.c.bf16 %v349_v24, %v345_v23  ;;  %v344_v30 = vld [vmem:[%s1643_s1 + $0x5c0] sm:$0xff] }
  0x4f   : > { %931 = vmatpush1.bf16.msra.mxu1 %v930_v31  ;;  %833 = vmatprep.subr.bf16.mxu0 %v832_v32  ;;  %v348_v31 = vld [vmem:[%s1643_s1 + $0x5e0] sm:$0xff]  ;;  %v346_v32 = vld [vmem:[%s1643_s1 + $0x5d0] sm:$0xff] }
  0x50   : > { %933 = vmatprep.subr.bf16.mxu1 %v932_v36  ;;  %752 = vmatprep.mubr.msk.f32.mxu0 %vm360_vm0, %v155_v42  ;;  %v357_v36 = vld [vmem:[%s1643_s1 + $0x628] sm:$0xff]  ;;  %v854_v39 = vpack.c.bf16 %v348_v31, %v344_v30  ;;  %v954_v40 = vpack.c.bf16 %v350_v34, %v346_v32 }
  0x51   : > { %754 = vmatprep.mubr.msk.f32.mxu1 %vm360_vm0, %v155_v42  ;;  %v856_v41 = vpack.c.bf16 %v357_v36, %v353_v35  ;;  %v352_v42 = vld [vmem:[%s1643_s1 + $0x600] sm:$0xff] }
  0x52   : > { %835 = vmatpush1.bf16.msra.mxu0 %v834_v43  ;;  %v356_v43 = vld [vmem:[%s1643_s1 + $0x620] sm:$0xff] }
  0x53   : > { %935 = vmatpush1.bf16.msra.mxu1 %v934_v44  ;;  %837 = vmatprep.subr.bf16.mxu0 %v836_v45  ;;  %v956_v44 = vpack.c.bf16 %v359_v38, %v355_v37  ;;  %v354_v45 = vld [vmem:[%s1643_s1 + $0x610] sm:$0xff]  ;;  %v858_v47 = vpack.c.bf16 %v356_v43, %v352_v42 }
  0x54   : > { %937 = vmatprep.subr.bf16.mxu1 %v936_v49  ;;  %v958_v48 = vpack.c.bf16 %v358_v46, %v354_v45  ;;  %v154_v49 = vld [vmem:[%s1294_s10 + $0x10] sm:$0xff] }
  0x56   : > { %839 = vmatpush1.bf16.msra.mxu0 %v838_v55 }
  0x57   : > { %939 = vmatpush1.bf16.msra.mxu1 %v938_v56  ;;  %841 = vmatprep.subr.bf16.mxu0 %v840_v57 }
  0x58   : > { %941 = vmatprep.subr.bf16.mxu1 %v940_v61 }
  0x5a   : > { %843 = vmatpush1.bf16.msra.mxu0 %v842_v3 }
  0x5b   : > { %943 = vmatpush1.bf16.msra.mxu1 %v942_v4  ;;  %845 = vmatprep.subr.bf16.mxu0 %v844_v5 }
  0x5c   : > { %945 = vmatprep.subr.bf16.mxu1 %v944_v9 }
  0x5e   : > { %847 = vmatpush1.bf16.msra.mxu0 %v846_v15 }
  0x5f   : > { %947 = vmatpush1.bf16.msra.mxu1 %v946_v16  ;;  %849 = vmatprep.subr.bf16.mxu0 %v848_v17 }
  0x60   : > { %949 = vmatprep.subr.bf16.mxu1 %v948_v21 }
  0x62   : > { %851 = vmatpush1.bf16.msra.mxu0 %v850_v27 }
  0x63   : > { %951 = vmatpush1.bf16.msra.mxu1 %v950_v28  ;;  %853 = vmatprep.subr.bf16.mxu0 %v852_v29 }
  0x64   : > { %953 = vmatprep.subr.bf16.mxu1 %v952_v33 }
  0x66   : > { %855 = vmatpush1.bf16.msra.mxu0 %v854_v39 }
  0x67   : > { %955 = vmatpush1.bf16.msra.mxu1 %v954_v40  ;;  %857 = vmatprep.subr.bf16.mxu0 %v856_v41 }
  0x68   : > { %957 = vmatprep.subr.bf16.mxu1 %v956_v44 }
  0x6a   : > { %859 = vmatpush1.bf16.msra.mxu0 %v858_v47 }
  0x6b   : > { %959 = vmatpush1.bf16.msra.mxu1 %v958_v48 }
  0x6d   : > { %509 = vmatmul.mubr.f32.vlgmr.msra.gmra.mrb[0].mxu0 %v154_v49 }
  0x6e   : > { %663 = vmatmul.mubr.f32.vlgmr.msra.gmra.mrb[0].mxu1 %v154_v49  ;;  %753 = vmatprep.mubr.msk.f32.mxu0 %vm360_vm0, %v159_v50 }
  0x6f   : > { %755 = vmatprep.mubr.msk.f32.mxu1 %vm360_vm0, %v159_v50 }
  0x71   : > { %515 = vmatmul.mubr.f32.gmra.mrb[2].mxu0 %v158_v51 }
  0x72   : > { %669 = vmatmul.mubr.f32.gmra.mrb[2].mxu1 %v158_v51 }
 0x140   : > { %v510_v52 = vpop.f32.mrb[0].mxu0 }
 0x141   : > { %675 = vst [vmem:[%s150_s19] sm:$0xff] %v510_v52  ;;  %v664_v53 = vpop.f32.mrb[0].mxu1  ;;  %v512_v54 = vpop.f32.mrb[1].mxu0 }
 0x142   : > { %677 = vst [vmem:[%s150_s19 + $0x10] sm:$0xff] %v664_v53  ;;  %676 = vst [vmem:[%s150_s19 + $0x8] sm:$0xff] %v512_v54  ;;  %v666_v55 = vpop.f32.mrb[1].mxu1 }
 0x143   : > { %678 = vst.msk [vmem:[%s150_s19 + $0x18] sm:$0xff] %vm360_vm0, %v666_v55 }
 0x144   : > { %v516_v56 = vpop.f32.mrb[2].mxu0 }
 0x145   : > { %679 = vst [vmem:[%s150_s19 + $0x20] sm:$0xff] %v516_v56  ;;  %v670_v57 = vpop.f32.mrb[2].mxu1  ;;  %v518_v58 = vpop.f32.mrb[3].mxu0 }
 0x146   : > { %681 = vst [vmem:[%s150_s19 + $0x30] sm:$0xff] %v670_v57  ;;  %680 = vst [vmem:[%s150_s19 + $0x28] sm:$0xff] %v518_v58  ;;  %v672_v59 = vpop.f32.mrb[3].mxu1 }
 0x147   : > { %682 = vst.msk [vmem:[%s150_s19 + $0x38] sm:$0xff] %vm360_vm0, %v672_v59 }
 0x148 PF: > { %s12_s9 = sadd.s32 1, %s982_s9  }
 0x149   : > { %p9_p4 = scmp.ge.s32.totalorder %s12_s9, 6  }
 0x14b   :  { %11 = sbr.rel (!%p9_p4) target bundleno = 1 (0x1), region = 58 }

</bundles_post_ra>
